<compile_context>
chip_gen: v6e
topology: v6e:2x2x1
jax: 0.10.0
libtpu: 0.0.40
codegen_flags: <defaults>
</compile_context>

<pallas_src>
import jax
import jax.numpy as jnp
from jax.experimental import pallas as pl
from jax.experimental.pallas import tpu as pltpu


def owd_kernel(x_ref, m_ref, p_ref,
               wd_ref, bd_ref,            # depth predictor (1x1 conv over channels)
               we_ref, be_ref,            # encoder (flatten depth -> linear -> relu)
               wp_ref, wc_ref, bh_ref,    # decoder hidden layer (points + cond c)
               wo_ref, bo_ref,            # decoder output layer
               out_ref):
    # --- depth_predictor.get_last_predict: 1x1 conv over channels + relu ---
    # x: (C, HW) with HW on lanes; channel reduce = cheap sublane add over C.
    x = x_ref[...]                                                       # (C, HW)
    d = jnp.sum(x * wd_ref[...], axis=0, keepdims=True) + bd_ref[...]    # (1, HW)
    d = jnp.maximum(d, 0.0)

    # --- background_setting(depth_map, gt_mask, v=0.0): binary mask multiply ---
    d = d * m_ref[...]                                                   # (1, HW)

    # --- encoder: linear over flattened depth map, relu (MXU matmul) ---
    c = jnp.dot(d, we_ref[...], preferred_element_type=jnp.float32) + be_ref[...]  # (1, c_dim)
    c = jnp.maximum(c, 0.0)

    # --- decoder: conditioned MLP. z = p0_z.sample((B,)) has shape (B, 0)
    #     (empty Normal prior) and contributes nothing -> not materialized. ---
    # Conditioning row on the MXU.
    cbias = jnp.dot(c, wc_ref[...], preferred_element_type=jnp.float32) + bh_ref[...]  # (1, hidden)

    # Points contraction K=3 as three broadcast FMAs on the VPU (overlaps MXU work).
    pts = p_ref[...]                                                     # (T, 3)
    wp = wp_ref[...]                                                     # (3, hidden)
    h = (pts[:, 0:1] * wp[0:1, :]
         + pts[:, 1:2] * wp[1:2, :]
         + pts[:, 2:3] * wp[2:3, :])                                     # (T, hidden)
    h = jnp.maximum(h + cbias, 0.0)

    # Output layer: contract hidden of (1, hidden) with hidden of (T, hidden)
    # -> lane-dense (1, T) logits row (MXU, transposed-rhs matmul).
    logits = jax.lax.dot_general(
        wo_ref[...], h,
        dimension_numbers=(((1,), (1,)), ((), ())),
        preferred_element_type=jnp.float32) + bo_ref[...]                # (1, T)
    out_ref[...] = logits


def occupancy_with_depth_forward(p, inputs, gt_mask, params):
    """Returns Bernoulli logits of shape (B, T) (p_r = Bernoulli(logits=logits))."""
    B, C, H, W = inputs.shape
    T = p.shape[1]
    HW = H * W
    c_dim = params["we"].shape[1]
    hidden = params["wp"].shape[1]

    # NCHW -> (B, C, HW) is a free flatten; mask -> (B, 1, HW). HW lives on lanes.
    x_flat = inputs.reshape(B, C, HW)
    m_flat = gt_mask.reshape(B, 1, HW)

    sq = pl.Squeezed()
    param_spec = lambda shape: pl.BlockSpec(shape, lambda b: (0,) * len(shape))

    grid_spec = pltpu.PrefetchScalarGridSpec(
        num_scalar_prefetch=0,
        grid=(B,),
        in_specs=[
            pl.BlockSpec((sq, C, HW), lambda b: (b, 0, 0)),   # x_flat  (lane-dense HW)
            pl.BlockSpec((sq, 1, HW), lambda b: (b, 0, 0)),   # m_flat  (lane-dense HW)
            pl.BlockSpec((sq, T, 3), lambda b: (b, 0, 0)),    # p
            param_spec((C, 1)),                               # wd
            param_spec((1, 1)),                               # bd
            param_spec((HW, c_dim)),                          # we
            param_spec((1, c_dim)),                           # be
            param_spec((3, hidden)),                          # wp
            param_spec((c_dim, hidden)),                      # wc
            param_spec((1, hidden)),                          # bh
            param_spec((1, hidden)),                          # wo (row form)
            param_spec((1, 1)),                               # bo
        ],
        out_specs=pl.BlockSpec((sq, 1, T), lambda b: (b, 0, 0)),   # lane-dense logits row
    )

    out = pl.pallas_call(
        owd_kernel,
        out_shape=jax.ShapeDtypeStruct((B, 1, T), jnp.float32),
        grid_spec=grid_spec,
        compiler_params=pltpu.CompilerParams(
            dimension_semantics=("parallel",),       # >=2 steps keeps both v7x TCs busy
            vmem_limit_bytes=32 * 1024 * 1024,       # safe on v5e/v6e/v7x at these sizes
        ),
    )(x_flat, m_flat, p,
      params["wd"], params["bd"], params["we"], params["be"],
      params["wp"], params["wc"], params["bh"], params["wo"], params["bo"])

    return out[:, 0, :]  # (B, T)


def reference_forward(p, inputs, gt_mask, params):
    """Pure-JAX reference matching the kernel semantics."""
    B, C, H, W = inputs.shape
    x = inputs.reshape(B, C, H * W)                     # (B, C, HW)
    m = gt_mask.reshape(B, 1, H * W)                    # (B, 1, HW)
    d = jnp.maximum(jnp.einsum("bch,c->bh", x, params["wd"][:, 0]) + params["bd"][0, 0], 0.0)
    d = d * m[:, 0, :]                                   # (B, HW)
    c = jnp.maximum(d @ params["we"] + params["be"][0], 0.0)             # (B, c_dim)
    h = jnp.einsum("btd,dk->btk", p, params["wp"]) + (c @ params["wc"])[:, None, :] + params["bh"][0]
    h = jnp.maximum(h, 0.0)
    logits = jnp.einsum("btk,k->bt", h, params["wo"][0]) + params["bo"][0, 0]
    return logits


def make_params(key, C, HW, c_dim, hidden):
    ks = jax.random.split(key, 8)
    s = 0.1
    return {
        "wd": s * jax.random.normal(ks[0], (C, 1), jnp.float32),
        "bd": jnp.full((1, 1), 0.05, jnp.float32),
        "we": s * jax.random.normal(ks[1], (HW, c_dim), jnp.float32),
        "be": jnp.full((1, c_dim), 0.01, jnp.float32),
        "wp": s * jax.random.normal(ks[2], (3, hidden), jnp.float32),
        "wc": s * jax.random.normal(ks[3], (c_dim, hidden), jnp.float32),
        "bh": jnp.full((1, hidden), 0.02, jnp.float32),
        "wo": s * jax.random.normal(ks[4], (1, hidden), jnp.float32),
        "bo": jnp.full((1, 1), -0.1, jnp.float32),
    }


if __name__ == "__main__":
    B, C, H, W = 2, 4, 16, 16
    T, c_dim, hidden = 8, 32, 32

    key = jax.random.PRNGKey(0)
    k_in, k_mask, k_p, k_params = jax.random.split(key, 4)

    inputs = jax.random.normal(k_in, (B, C, H, W), jnp.float32)
    gt_mask = (jax.random.uniform(k_mask, (B, 1, H, W)) > 0.3).astype(jnp.float32)
    p = jax.random.uniform(k_p, (B, T, 3), jnp.float32, minval=-0.5, maxval=0.5)
    params = make_params(k_params, C, H * W, c_dim, hidden)

    # z = p0_z.sample((B,)) is an empty (B, 0) tensor (p0_z = Normal([], [])),
    # so it is a no-op in decode and is intentionally not materialized.
    logits = occupancy_with_depth_forward(p, inputs, gt_mask, params)
    jax.block_until_ready(logits)

    ref = reference_forward(p, inputs, gt_mask, params)
    assert logits.shape == (B, T)
    assert jnp.allclose(logits, ref, atol=1e-4, rtol=1e-4), "mismatch vs reference"

    # p_r = Bernoulli(logits=logits); probabilities are sigmoid(logits).
    probs = jax.nn.sigmoid(logits)
    jax.block_until_ready(probs)

    print("KERNEL_OK")
</pallas_src>

<mosaic_0001>
module attributes {stable_mosaic.version = 11 : i64} {
  func.func @owd_kernel(%arg0: i32, %arg1: memref<1x4x256xf32, #tpu.memory_space<vmem>>, %arg2: memref<1x1x256xf32, #tpu.memory_space<vmem>>, %arg3: memref<1x8x3xf32, #tpu.memory_space<vmem>>, %arg4: memref<4x1xf32, #tpu.memory_space<vmem>>, %arg5: memref<1x1xf32, #tpu.memory_space<vmem>>, %arg6: memref<256x32xf32, #tpu.memory_space<vmem>>, %arg7: memref<1x32xf32, #tpu.memory_space<vmem>>, %arg8: memref<3x32xf32, #tpu.memory_space<vmem>>, %arg9: memref<32x32xf32, #tpu.memory_space<vmem>>, %arg10: memref<1x32xf32, #tpu.memory_space<vmem>>, %arg11: memref<1x32xf32, #tpu.memory_space<vmem>>, %arg12: memref<1x1xf32, #tpu.memory_space<vmem>>, %arg13: memref<1x1x8xf32, #tpu.memory_space<vmem>>) attributes {dimension_semantics = [#tpu.dimension_semantics<parallel>], iteration_bounds = array<i64: 2>, scalar_prefetch = 0 : i64, scratch_operands = 0 : i64, tpu.core_type = #tpu.core_type<tc>, window_params = [{transform_indices = @transform_0, window_bounds = array<i64: 1, 4, 256>}, {transform_indices = @transform_1, window_bounds = array<i64: 1, 1, 256>}, {transform_indices = @transform_2, window_bounds = array<i64: 1, 8, 3>}, {pipeline_mode = #tpu.pipeline_mode<synchronous>, transform_indices = @transform_3, window_bounds = array<i64: 4, 1>}, {pipeline_mode = #tpu.pipeline_mode<synchronous>, transform_indices = @transform_4, window_bounds = array<i64: 1, 1>}, {pipeline_mode = #tpu.pipeline_mode<synchronous>, transform_indices = @transform_5, window_bounds = array<i64: 256, 32>}, {pipeline_mode = #tpu.pipeline_mode<synchronous>, transform_indices = @transform_6, window_bounds = array<i64: 1, 32>}, {pipeline_mode = #tpu.pipeline_mode<synchronous>, transform_indices = @transform_7, window_bounds = array<i64: 3, 32>}, {pipeline_mode = #tpu.pipeline_mode<synchronous>, transform_indices = @transform_8, window_bounds = array<i64: 32, 32>}, {pipeline_mode = #tpu.pipeline_mode<synchronous>, transform_indices = @transform_9, window_bounds = array<i64: 1, 32>}, {pipeline_mode = #tpu.pipeline_mode<synchronous>, transform_indices = @transform_10, window_bounds = array<i64: 1, 32>}, {pipeline_mode = #tpu.pipeline_mode<synchronous>, transform_indices = @transform_11, window_bounds = array<i64: 1, 1>}, {transform_indices = @transform_12, window_bounds = array<i64: 1, 1, 8>}]} {
    %c0 = arith.constant 0 : index
    %c0_0 = arith.constant 0 : index
    %c0_1 = arith.constant 0 : index
    %0 = vector.load %arg1[%c0, %c0_0, %c0_1] : memref<1x4x256xf32, #tpu.memory_space<vmem>>, vector<1x4x256xf32>
    %1 = vector.shape_cast %0 : vector<1x4x256xf32> to vector<4x256xf32>
    %c0_2 = arith.constant 0 : index
    %c0_3 = arith.constant 0 : index
    %2 = vector.load %arg4[%c0_2, %c0_3] : memref<4x1xf32, #tpu.memory_space<vmem>>, vector<4x1xf32>
    %3 = vector.broadcast %2 : vector<4x1xf32> to vector<4x256xf32>
    %4 = arith.mulf %1, %3 : vector<4x256xf32>
    %cst = arith.constant dense<0.000000e+00> : vector<256xf32>
    %5 = vector.multi_reduction <add>, %4, %cst [0] : vector<4x256xf32> to vector<256xf32>
    %6 = vector.shape_cast %5 : vector<256xf32> to vector<1x256xf32>
    %c0_4 = arith.constant 0 : index
    %c0_5 = arith.constant 0 : index
    %7 = vector.load %arg5[%c0_4, %c0_5] : memref<1x1xf32, #tpu.memory_space<vmem>>, vector<1x1xf32>
    %8 = vector.broadcast %7 : vector<1x1xf32> to vector<1x256xf32>
    %9 = arith.addf %6, %8 : vector<1x256xf32>
    %cst_6 = arith.constant 0.000000e+00 : f32
    %10 = vector.broadcast %cst_6 : f32 to vector<1x256xf32>
    %11 = arith.maximumf %9, %10 : vector<1x256xf32>
    %c0_7 = arith.constant 0 : index
    %c0_8 = arith.constant 0 : index
    %c0_9 = arith.constant 0 : index
    %12 = vector.load %arg2[%c0_7, %c0_8, %c0_9] : memref<1x1x256xf32, #tpu.memory_space<vmem>>, vector<1x1x256xf32>
    %13 = vector.shape_cast %12 : vector<1x1x256xf32> to vector<1x256xf32>
    %14 = arith.mulf %11, %13 : vector<1x256xf32>
    %c0_10 = arith.constant 0 : index
    %c0_11 = arith.constant 0 : index
    %15 = vector.load %arg6[%c0_10, %c0_11] : memref<256x32xf32, #tpu.memory_space<vmem>>, vector<256x32xf32>
    %cst_12 = arith.constant dense<0.000000e+00> : vector<1x32xf32>
    %16 = tpu.matmul %14, %15, %cst_12 {dimension_numbers = #tpu.dot_dimension_numbers<[1], [0], [0], [1], [0, 0, 1, 1], [], []>} : vector<1x256xf32>, vector<256x32xf32>, vector<1x32xf32> -> vector<1x32xf32>
    %c0_13 = arith.constant 0 : index
    %c0_14 = arith.constant 0 : index
    %17 = vector.load %arg7[%c0_13, %c0_14] : memref<1x32xf32, #tpu.memory_space<vmem>>, vector<1x32xf32>
    %18 = arith.addf %16, %17 : vector<1x32xf32>
    %cst_15 = arith.constant 0.000000e+00 : f32
    %19 = vector.broadcast %cst_15 : f32 to vector<1x32xf32>
    %20 = arith.maximumf %18, %19 : vector<1x32xf32>
    %c0_16 = arith.constant 0 : index
    %c0_17 = arith.constant 0 : index
    %21 = vector.load %arg9[%c0_16, %c0_17] : memref<32x32xf32, #tpu.memory_space<vmem>>, vector<32x32xf32>
    %cst_18 = arith.constant dense<0.000000e+00> : vector<1x32xf32>
    %22 = tpu.matmul %20, %21, %cst_18 {dimension_numbers = #tpu.dot_dimension_numbers<[1], [0], [0], [1], [0, 0, 1, 1], [], []>} : vector<1x32xf32>, vector<32x32xf32>, vector<1x32xf32> -> vector<1x32xf32>
    %c0_19 = arith.constant 0 : index
    %c0_20 = arith.constant 0 : index
    %23 = vector.load %arg10[%c0_19, %c0_20] : memref<1x32xf32, #tpu.memory_space<vmem>>, vector<1x32xf32>
    %24 = arith.addf %22, %23 : vector<1x32xf32>
    %c0_21 = arith.constant 0 : index
    %c0_22 = arith.constant 0 : index
    %c0_23 = arith.constant 0 : index
    %25 = vector.load %arg3[%c0_21, %c0_22, %c0_23] : memref<1x8x3xf32, #tpu.memory_space<vmem>>, vector<1x8x3xf32>
    %26 = vector.shape_cast %25 : vector<1x8x3xf32> to vector<8x3xf32>
    %c0_24 = arith.constant 0 : index
    %c0_25 = arith.constant 0 : index
    %27 = vector.load %arg8[%c0_24, %c0_25] : memref<3x32xf32, #tpu.memory_space<vmem>>, vector<3x32xf32>
    %28 = vector.extract_strided_slice %26 {offsets = [0, 0], sizes = [8, 1], strides = [1, 1]} : vector<8x3xf32> to vector<8x1xf32>
    %29 = vector.extract_strided_slice %27 {offsets = [0, 0], sizes = [1, 32], strides = [1, 1]} : vector<3x32xf32> to vector<1x32xf32>
    %30 = vector.broadcast %28 : vector<8x1xf32> to vector<8x32xf32>
    %31 = vector.broadcast %29 : vector<1x32xf32> to vector<8x32xf32>
    %32 = arith.mulf %30, %31 : vector<8x32xf32>
    %33 = vector.extract_strided_slice %26 {offsets = [0, 1], sizes = [8, 1], strides = [1, 1]} : vector<8x3xf32> to vector<8x1xf32>
    %34 = vector.extract_strided_slice %27 {offsets = [1, 0], sizes = [1, 32], strides = [1, 1]} : vector<3x32xf32> to vector<1x32xf32>
    %35 = vector.broadcast %33 : vector<8x1xf32> to vector<8x32xf32>
    %36 = vector.broadcast %34 : vector<1x32xf32> to vector<8x32xf32>
    %37 = arith.mulf %35, %36 : vector<8x32xf32>
    %38 = arith.addf %32, %37 : vector<8x32xf32>
    %39 = vector.extract_strided_slice %26 {offsets = [0, 2], sizes = [8, 1], strides = [1, 1]} : vector<8x3xf32> to vector<8x1xf32>
    %40 = vector.extract_strided_slice %27 {offsets = [2, 0], sizes = [1, 32], strides = [1, 1]} : vector<3x32xf32> to vector<1x32xf32>
    %41 = vector.broadcast %39 : vector<8x1xf32> to vector<8x32xf32>
    %42 = vector.broadcast %40 : vector<1x32xf32> to vector<8x32xf32>
    %43 = arith.mulf %41, %42 : vector<8x32xf32>
    %44 = arith.addf %38, %43 : vector<8x32xf32>
    %45 = vector.broadcast %24 : vector<1x32xf32> to vector<8x32xf32>
    %46 = arith.addf %44, %45 : vector<8x32xf32>
    %cst_26 = arith.constant 0.000000e+00 : f32
    %47 = vector.broadcast %cst_26 : f32 to vector<8x32xf32>
    %48 = arith.maximumf %46, %47 : vector<8x32xf32>
    %c0_27 = arith.constant 0 : index
    %c0_28 = arith.constant 0 : index
    %49 = vector.load %arg11[%c0_27, %c0_28] : memref<1x32xf32, #tpu.memory_space<vmem>>, vector<1x32xf32>
    %cst_29 = arith.constant dense<0.000000e+00> : vector<1x8xf32>
    %50 = tpu.matmul %49, %48, %cst_29 {dimension_numbers = #tpu.dot_dimension_numbers<[1], [1], [0], [0], [0, 0, 1, 0], [], []>} : vector<1x32xf32>, vector<8x32xf32>, vector<1x8xf32> -> vector<1x8xf32>
    %c0_30 = arith.constant 0 : index
    %c0_31 = arith.constant 0 : index
    %51 = vector.load %arg12[%c0_30, %c0_31] : memref<1x1xf32, #tpu.memory_space<vmem>>, vector<1x1xf32>
    %52 = vector.broadcast %51 : vector<1x1xf32> to vector<1x8xf32>
    %53 = arith.addf %50, %52 : vector<1x8xf32>
    %c0_32 = arith.constant 0 : index
    %c0_33 = arith.constant 0 : index
    %c0_34 = arith.constant 0 : index
    %54 = vector.load %arg13[%c0_32, %c0_33, %c0_34] : memref<1x1x8xf32, #tpu.memory_space<vmem>>, vector<1x1x8xf32>
    %55 = vector.shape_cast %54 : vector<1x1x8xf32> to vector<1x8xf32>
    %56 = vector.shape_cast %53 : vector<1x8xf32> to vector<1x1x8xf32>
    tpu.vector_store %arg13[%c0_32, %c0_33, %c0_34], %56 {strides = array<i32>} : memref<1x1x8xf32, #tpu.memory_space<vmem>>, vector<1x1x8xf32>,
    return
  }
  func.func @transform_0(%arg0: i32) -> (i32, i32, i32) {
    %c0_i32 = arith.constant 0 : i32
    %c0_i32_0 = arith.constant 0 : i32
    %c0_i32_1 = arith.constant 0 : i32
    return %arg0, %c0_i32, %c0_i32_0 : i32, i32, i32
  }
  func.func @transform_1(%arg0: i32) -> (i32, i32, i32) {
    %c0_i32 = arith.constant 0 : i32
    %c0_i32_0 = arith.constant 0 : i32
    %c0_i32_1 = arith.constant 0 : i32
    return %arg0, %c0_i32, %c0_i32_0 : i32, i32, i32
  }
  func.func @transform_2(%arg0: i32) -> (i32, i32, i32) {
    %c0_i32 = arith.constant 0 : i32
    %c0_i32_0 = arith.constant 0 : i32
    %c0_i32_1 = arith.constant 0 : i32
    return %arg0, %c0_i32, %c0_i32_0 : i32, i32, i32
  }
  func.func @transform_3(%arg0: i32) -> (i32, i32) {
    %c0_i32 = arith.constant 0 : i32
    %c0_i32_0 = arith.constant 0 : i32
    %c0_i32_1 = arith.constant 0 : i32
    return %c0_i32, %c0_i32_0 : i32, i32
  }
  func.func @transform_4(%arg0: i32) -> (i32, i32) {
    %c0_i32 = arith.constant 0 : i32
    %c0_i32_0 = arith.constant 0 : i32
    %c0_i32_1 = arith.constant 0 : i32
    return %c0_i32, %c0_i32_0 : i32, i32
  }
  func.func @transform_5(%arg0: i32) -> (i32, i32) {
    %c0_i32 = arith.constant 0 : i32
    %c0_i32_0 = arith.constant 0 : i32
    %c0_i32_1 = arith.constant 0 : i32
    return %c0_i32, %c0_i32_0 : i32, i32
  }
  func.func @transform_6(%arg0: i32) -> (i32, i32) {
    %c0_i32 = arith.constant 0 : i32
    %c0_i32_0 = arith.constant 0 : i32
    %c0_i32_1 = arith.constant 0 : i32
    return %c0_i32, %c0_i32_0 : i32, i32
  }
  func.func @transform_7(%arg0: i32) -> (i32, i32) {
    %c0_i32 = arith.constant 0 : i32
    %c0_i32_0 = arith.constant 0 : i32
    %c0_i32_1 = arith.constant 0 : i32
    return %c0_i32, %c0_i32_0 : i32, i32
  }
  func.func @transform_8(%arg0: i32) -> (i32, i32) {
    %c0_i32 = arith.constant 0 : i32
    %c0_i32_0 = arith.constant 0 : i32
    %c0_i32_1 = arith.constant 0 : i32
    return %c0_i32, %c0_i32_0 : i32, i32
  }
  func.func @transform_9(%arg0: i32) -> (i32, i32) {
    %c0_i32 = arith.constant 0 : i32
    %c0_i32_0 = arith.constant 0 : i32
    %c0_i32_1 = arith.constant 0 : i32
    return %c0_i32, %c0_i32_0 : i32, i32
  }
  func.func @transform_10(%arg0: i32) -> (i32, i32) {
    %c0_i32 = arith.constant 0 : i32
    %c0_i32_0 = arith.constant 0 : i32
    %c0_i32_1 = arith.constant 0 : i32
    return %c0_i32, %c0_i32_0 : i32, i32
  }
  func.func @transform_11(%arg0: i32) -> (i32, i32) {
    %c0_i32 = arith.constant 0 : i32
    %c0_i32_0 = arith.constant 0 : i32
    %c0_i32_1 = arith.constant 0 : i32
    return %c0_i32, %c0_i32_0 : i32, i32
  }
  func.func @transform_12(%arg0: i32) -> (i32, i32, i32) {
    %c0_i32 = arith.constant 0 : i32
    %c0_i32_0 = arith.constant 0 : i32
    %c0_i32_1 = arith.constant 0 : i32
    return %arg0, %c0_i32, %c0_i32_0 : i32, i32, i32
  }
}

</mosaic_0001>

<bundles_post_ra>
// kernel: tpu_custom_call.1
= control target key start
LH: loop header
LB: loop body
LE: loop exit
PB: predicated region body
PF: predicated region fallthrough
CT: control target
= control target key end

     0   :  { %s1428_s0 = inlined_call_operand.vmem [shape: f32[2,4,256], index: 0, kind: input, shape index: {}]   ;;  %s1429_s1 = inlined_call_operand.vmem [shape: f32[2,1,256], index: 1, kind: input, shape index: {}]   ;;  %s1430_s2 = inlined_call_operand.vmem [shape: f32[2,8,3], index: 2, kind: input, shape index: {}]   ;;  %s1431_s3 = inlined_call_operand.vmem [shape: f32[4,1], index: 3, kind: input, shape index: {}]   ;;  %s1432_s4 = inlined_call_operand.<no memory space> [shape: f32[1,1], index: 4, kind: input, shape index: {}]   ;;  %s1433_s5 = inlined_call_operand.vmem [shape: f32[256,32], index: 5, kind: input, shape index: {}]   ;;  %s1434_s6 = inlined_call_operand.vmem [shape: f32[1,32], index: 6, kind: input, shape index: {}]   ;;  %s1435_s7 = inlined_call_operand.vmem [shape: f32[3,32], index: 7, kind: input, shape index: {}]   ;;  %s1436_s8 = inlined_call_operand.vmem [shape: f32[32,32], index: 8, kind: input, shape index: {}]   ;;  %s1437_s9 = inlined_call_operand.vmem [shape: f32[1,32], index: 9, kind: input, shape index: {}]   ;;  %s1438_s10 = inlined_call_operand.vmem [shape: f32[1,32], index: 10, kind: input, shape index: {}]   ;;  %s1439_s12 = inlined_call_operand.hbm [shape: f32[2,1,8], index: 12, kind: output, shape index: {}]   ;;  %s1440_s11 = inlined_call_operand.<no memory space> [shape: f32[1,1], index: 11, kind: input, shape index: {}]  }
   0x1   :  { %v17_v0 = vstv %s1432_s4  ;;  %v19_v1 = vstv %s1440_s11 }
   0x2   :  { %18 = vst [vmem:[#allocation2] sm:$0x1] %v17_v0  ;;  %20 = vst [vmem:[#allocation3] sm:$0x1] %v19_v1 }
   0x3   :  { %21 = vsyncpa [#allocation5], 0 }
   0x4   :  { %23 = vsyncpa [#allocation5 + $0x1], 0  ;;  %s1176_s25 = smov 0   ;;  %s1178_s26 = smov 0  }
   0x5   :  { %s1180_s27 = smov 0   ;;  %s1182_s28 = smov 0  }
   0x6 LB: > { %s1197_s4 = sadd.s32 4294967295, %s1096_s28   ;;  %s912_s11 = sadd.s32 4294967294, %s1096_s28   ;;  %s1096_s28 = sphi %s1182_s28, %s1446_s28   ;;  %s1092_s27 = sphi %s1180_s27, %s1445_s27   ;;  %s1088_s26 = sphi %s1178_s26, %s1444_s26   ;;  %s1084_s25 = sphi %s1176_s25, %s1443_s25  }
   0x7   : > { %s1201_s29 = sadd.s32 1, %s1096_s28   ;;  %s303_s30 = sadd.s32 1, %s1092_s27 }
   0x8   : > { %s300_s13 = ssub.s32 %s1096_s28, %s1201_s29  ;;  %p313_p0 = scmp.ne.s32.totalorder %s1092_s27, %s1088_s26 }
   0x9   : > { %p301_p1 = scmp.eq.s32.totalorder %s300_s13, 0  ;;  %p314_p2 = scmp.eq.s32.totalorder %s1197_s4, 1 }
   0xa   : > { %p319_p3 = scmp.ne.s32.totalorder %s1088_s26, %s1084_s25  ;;  %p320_p4 = scmp.eq.s32.totalorder %s912_s11, 1 }
   0xb   : > { %s1212_s14 = scalar_select %p301_p1, %s1092_s27, %s303_s30  }
   0xc   : > { %p1214_p5 = por %p314_p2, %p313_p0  ;;  %p1218_p6 = por %p320_p4, %p319_p3 }
   0xd   : > { %p915_p7 = scmp.ge.s32.totalorder %s1096_s28, 1  ;;  %p387_p8 = scmp.lt.s32.totalorder %s1096_s28, 3 }
   0xf   : > { %p388_p9 = pnand %p915_p7, %p387_p8 }
  0x10   : > { %p436_p10 = scmp.lt.s32.totalorder (!%p388_p9), %s1197_s4, 1  ;;  %s923_s30 = sshll.u32 (!%p388_p9), %s1197_s4, 4 }
  0x11   : > { %391 = sbr.rel (%p388_p9) target bundleno = 787 (0x313), region = 68  ;;  %s1393_s20 = scalar_lea.hbm (!%p388_p9), %s1439_s12, %s923_s30 }
  0x16   : > { %v450_v2 = vld [vmem:[%s1431_s3] sm:$0xf]  ;;  %v541_v3 = vld [vmem:[%s1433_s5 + $0xf8] sm:$0xff]  ;;  %v1098_v4 = vmov 0   ;;  %v540_v6 = vld [vmem:[%s1433_s5 + $0xf0] sm:$0xff]  ;;  %v458_v39 = vlaneseq  ;;  %s1327_s17 = scalar_select %p436_p10, %s1197_s4, 1 }
  0x17   : > { %1030 = vset.pattern.permute.xlu0 %v1098_v4  ;;  %927 = vmatprep.subr.mxu0 %v541_v3  ;;  %v525_v5 = vld [vmem:[%s1433_s5 + $0x78] sm:$0xff]  ;;  %v524_v7 = vld [vmem:[%s1433_s5 + $0x70] sm:$0xff]  ;;  %v539_v8 = vld [vmem:[%s1433_s5 + $0xe8] sm:$0xff]  ;;  %v1099_v37 = vmov 839922192   ;;  %vm467_vm0 = vcmask 1043456  }
  0x18   : > { %453 = vperm.xlu0 %1030, %v450_v2   ;;  %928 = vmatpush3.msra.mxu0 %v525_v5  ;;  %v482_v9 = vld [vmem:[#allocation2] sm:$0x1]  ;;  %v523_v10 = vld [vmem:[%s1433_s5 + $0x68] sm:$0xff]  ;;  %v537_v13 = vld [vmem:[%s1433_s5 + $0xd8] sm:$0xff]  ;;  %v456_v38 = vunpack.c.l.s4 %v1099_v37  ;;  %v1329_v41 = vshrl.u32 %v458_v39, 7  ;;  %s926_s18 = sshll.u32 %s1327_s17, 3 }
  0x19   : > { %929 = vmatprep.subr.mxu0 %v540_v6  ;;  %1031 = vset.pattern.permute.xlu1 %v1098_v4  ;;  %v538_v11 = vld [vmem:[%s1433_s5 + $0xe0] sm:$0xff]  ;;  %v521_v14 = vld [vmem:[%s1433_s5 + $0x58] sm:$0xff]  ;;  %v536_v15 = vld [vmem:[%s1433_s5 + $0xd0] sm:$0xff]  ;;  %s440_s21 = scalar_lea.vmem %s1428_s0, %s926_s18  ;;  %s918_s22 = sshll.u32 %s1327_s17, 1  ;;  %vm1101_vm1 = vmmov 0   ;;  %vm619_vm2 = vcmask 261120  }
  0x1a   : > { %930 = vmatpush3.msra.mxu0 %v524_v7  ;;  %v522_v12 = vld [vmem:[%s1433_s5 + $0x60] sm:$0xff]  ;;  %v520_v16 = vld [vmem:[%s1433_s5 + $0x50] sm:$0xff]  ;;  %v535_v17 = vld [vmem:[%s1433_s5 + $0xc8] sm:$0xff]  ;;  %v457_v40 = vunpack.c.0.s8 %v456_v38  ;;  %v1339_v55 = vsub.s32 0, %v1329_v41  ;;  %s444_s11 = scalar_lea.vmem %s1429_s1, %s918_s22  ;;  %v504_v0 = vsub.s32 1, %v1329_v41  ;;  %s448_s13 = scalar_lea.vmem %s1430_s2, %s926_s18  ;;  %vm818_vm3 = vcmask 57344  }
  0x1b   : > { %931 = vmatprep.subr.mxu0 %v539_v8  ;;  %v519_v18 = vld [vmem:[%s1433_s5 + $0x48] sm:$0xff]  ;;  %v534_v19 = vld [vmem:[%s1433_s5 + $0xc0] sm:$0xff]  ;;  %v533_v21 = vld [vmem:[%s1433_s5 + $0xb8] sm:$0xff]  ;;  %s1104_s4 = smov [#allocation4]  }
  0x1c   : > { %485 = vperm.xlu0 %1030, %v482_v9   ;;  %932 = vmatpush3.msra.mxu0 %v523_v10  ;;  %v518_v20 = vld [vmem:[%s1433_s5 + $0x40] sm:$0xff]  ;;  %v517_v22 = vld [vmem:[%s1433_s5 + $0x38] sm:$0xff]  ;;  %v532_v23 = vld [vmem:[%s1433_s5 + $0xb0] sm:$0xff]  ;;  %v460_v42 = vsub.s32 %v457_v40, %v1329_v41  ;;  %s1040_s23 = sshll.u32 %s1104_s4, 4  ;;  %s1041_s23 = int_to_ptr.vmem [resolvable:$false] %s1040_s23 }
  0x1d   : > { %933 = vmatprep.subr.mxu0 %v538_v11  ;;  %v516_v24 = vld [vmem:[%s1433_s5 + $0x30] sm:$0xff]  ;;  %v531_v25 = vld [vmem:[%s1433_s5 + $0xa8] sm:$0xff]  ;;  %v530_v27 = vld [vmem:[%s1433_s5 + $0xa0] sm:$0xff]  ;;  %s1042_s24 = scalar_lea.vmem %s1041_s23, 32 }
  0x1e   : > { %934 = vmatpush3.msra.mxu0 %v522_v12  ;;  %v515_v26 = vld [vmem:[%s1433_s5 + $0x28] sm:$0xff]  ;;  %v514_v28 = vld [vmem:[%s1433_s5 + $0x20] sm:$0xff]  ;;  %v529_v29 = vld [vmem:[%s1433_s5 + $0x98] sm:$0xff]  ;;  %v1100_v12 = vmov 0.0  }
  0x1f   : > { %935 = vmatprep.subr.mxu0 %v537_v13  ;;  %v513_v30 = vld [vmem:[%s1433_s5 + $0x18] sm:$0xff]  ;;  %v528_v31 = vld [vmem:[%s1433_s5 + $0x90] sm:$0xff]  ;;  %v527_v33 = vld [vmem:[%s1433_s5 + $0x88] sm:$0xff]  ;;  %969 = vmatprep.subr.mxu1 %v1100_v12 }
  0x20   : > { %936 = vmatpush3.msra.mxu0 %v521_v14  ;;  %v512_v32 = vld [vmem:[%s1433_s5 + $0x10] sm:$0xff]  ;;  %v511_v34 = vld [vmem:[%s1433_s5 + $0x8] sm:$0xff]  ;;  %v526_v35 = vld [vmem:[%s1433_s5 + $0x80] sm:$0xff]  ;;  %977 = vmatprep.mubr.msk.f32.mxu1 %vm1101_vm1, %v1100_v12 }
  0x21   : > { %937 = vmatprep.subr.mxu0 %v536_v15  ;;  %v510_v36 = vld [vmem:[%s1433_s5] sm:$0xff]  ;;  %v617_v13 = vld [vmem:[%s1436_s8 + $0x18] sm:$0xff]  ;;  %v616_v14 = vld [vmem:[%s1436_s8 + $0x10] sm:$0xff] }
  0x22   : > { %938 = vmatpush3.msra.mxu0 %v520_v16  ;;  %v449_v44 = vld [vmem:[%s440_s21] sm:$0xff]  ;;  %970 = vmatpush3.msra.mxu1 %v617_v13  ;;  %v615_v15 = vld [vmem:[%s1436_s8 + $0x8] sm:$0xff] }
  0x23   : > { %939 = vmatprep.subr.mxu0 %v535_v17  ;;  %v496_v3 = vld [vmem:[%s444_s11] sm:$0x3]  ;;  %971 = vmatprep.subr.mxu1 %v1100_v12  ;;  %s434_s11 = sand.u32 1, %s1088_s26  }
  0x24   : > { %940 = vmatpush3.msra.mxu0 %v519_v18  ;;  %v505_v6 = vrot.slane %v496_v3, %v504_v0  ;;  %v501_v8 = vrot.slane %v496_v3, %v1339_v55  ;;  %972 = vmatpush3.msra.mxu1 %v616_v14  ;;  %v614_v16 = vld [vmem:[%s1436_s8] sm:$0xff]  ;;  %v1102_v18 = vmov 2   ;;  %s821_s21 = scalar_lea.sflag [#allocation5], %s434_s11 }
  0x25   : > { %941 = vmatprep.subr.mxu0 %v534_v19  ;;  %973 = vmatprep.subr.mxu1 %v1100_v12  ;;  %v693_v17 = vld [vmem:[%s448_s13] sm:$0xff]  ;;  %v1103_v19 = vmov 1   ;;  %s435_s13 = scalar_lea.vmem [#allocation4], %s434_s11 }
  0x26   : > { %942 = vmatpush3.msra.mxu0 %v518_v20  ;;  %974 = vmatpush3.msra.mxu1 %v615_v15  ;;  %s833_s19 = sshll.u32 %s435_s13, 4  ;;  %s834_s19 = int_to_ptr.vmem [resolvable:$true] %s833_s19 }
  0x27   : > { %943 = vmatprep.subr.mxu0 %v533_v21  ;;  %975 = vmatprep.subr.mxu1 %v1100_v12  ;;  %v542_v21 = vld [vmem:[%s1434_s6] sm:$0x1]  ;;  %s1036_s22 = scalar_lea.vmem %s834_s19, 16  ;;  %p1043_p0 = scmp.lt.s32.totalorder %s834_s19, %s1041_s23 }
  0x28   : > { %944 = vmatpush3.msra.mxu0 %v517_v22  ;;  %976 = vmatpush3.msra.mxu1 %v614_v16  ;;  %p1037_p11 = scmp.ne.s32.totalorder %s834_s19, %s1036_s22  ;;  %p1044_p1 = scmp.lt.s32.totalorder %s1042_s24, %s1036_s22 }
  0x29   : > { %945 = vmatprep.subr.mxu0 %v532_v23  ;;  %980 = vmatprep.subr.mxu1 %v1100_v12 }
  0x2a   : > { %946 = vmatpush3.msra.mxu0 %v516_v24  ;;  %1033 = vset.pattern.permute.xlu0 %v1102_v18  ;;  %p1038_p12 = pnand %p1037_p11, %p1214_p5  ;;  %p1045_p2 = por %p1044_p1, %p1043_p0 }
  0x2b   : > { %947 = vmatprep.subr.mxu0 %v531_v25  ;;  %697 = vperm.xlu1 %1031, %v693_v17  }
  0x2c   : > { %948 = vmatpush3.msra.mxu0 %v515_v26  ;;  %716 = vperm.xlu0 %1033, %v693_v17   ;;  %v732_v26 = vld [vmem:[#allocation3] sm:$0x1]  ;;  %p1039_p13 = pneg %p1038_p12 }
  0x2d   : > { %949 = vmatprep.subr.mxu0 %v530_v27 }
  0x2e   : > { %950 = vmatpush3.msra.mxu0 %v514_v28  ;;  %p1046_p3 = pnand %p1045_p2, %p1039_p13 }
  0x2f   : > { %951 = vmatprep.subr.mxu0 %v529_v29  ;;  %1032 = vset.pattern.permute.xlu1 %v1103_v19 }
  0x30   : > { %952 = vmatpush3.msra.mxu0 %v513_v30  ;;  %1035 = vset.pattern.permute.xlu0 %v1098_v4  ;;  %v721_v30 = vsub.s32 2, %v1329_v41 }
  0x31   : > { %953 = vmatprep.subr.mxu0 %v528_v31  ;;  %706 = vperm.xlu1 %1032, %v693_v17  }
  0x32   : > { %954 = vmatpush3.msra.mxu0 %v512_v32 }
  0x33   : > { %955 = vmatprep.subr.mxu0 %v527_v33 }
  0x34   : > { %956 = vmatpush3.msra.mxu0 %v511_v34 }
  0x35   : > { %957 = vmatprep.subr.mxu0 %v526_v35  ;;  %1034 = vset.pattern.permute.xlu1 %v1098_v4  ;;  %v694_v4 = vld [vmem:[%s1435_s7] sm:$0x7] }
  0x36   : > { %958 = vmatpush3.msra.mxu0 %v510_v36  ;;  %735 = vperm.xlu1 %1034, %v732_v26   ;;  %v703_v28 = vrot.slane %v694_v4, %v1339_v55  ;;  %v712_v29 = vrot.slane %v694_v4, %v504_v0  ;;  %v722_v34 = vrot.slane %v694_v4, %v721_v30  ;;  %v618_v36 = vld [vmem:[%s1437_s9] sm:$0x1] }
  0x93   : > { %v454_v43 = vpop.permute.xlu0 %453 }
  0x94   : > { %v461_v45 = vrot.slane %v454_v43, %v460_v42 }
  0x96   : > { %v463_v46 = vmul.f32 %v461_v45, %v449_v44 }
  0x97   : > { %v486_v58 = vpop.permute.xlu0 %485 }
  0x98   : > { %v465_v47 = vcombine.high %v463_v46, %v463_v46  ;;  %v468_v48 = vsel %vm467_vm0, %v463_v46, 0.0  ;;  %v491_v62 = vrot.slane %v486_v58, %v1339_v55  ;;  %v731_v46 = vld [vmem:[%s1438_s10] sm:$0x1] }
  0x99   : > { %v469_v49 = vrot.slane %v468_v48, 4 }
  0x9a   : > { %v475_v50 = vsel %vm467_vm0, %v465_v47, 0.0 }
  0x9b   : > { %v470_v51 = vadd.f32 %v469_v49, %v468_v48  ;;  %v476_v52 = vrot.slane %v475_v50, 4 }
  0x9d   : > { %v471_v53 = vrot.slane %v470_v51, 2  ;;  %v477_v54 = vadd.f32 %v476_v52, %v475_v50 }
  0x9f   : > { %v472_v56 = vadd.f32 %v471_v53, %v470_v51  ;;  %v478_v57 = vrot.slane %v477_v54, 2 }
  0xa1   : > { %v473_v59 = vrot.slane %v472_v56, 1  ;;  %v479_v60 = vadd.f32 %v478_v57, %v477_v54 }
  0xa3   : > { %v474_v61 = vadd.f32 %v473_v59, %v472_v56  ;;  %v480_v63 = vrot.slane %v479_v60, 1 }
  0xa5   : > { %v492_v1 = vadd.f32 %v491_v62, %v474_v61  ;;  %v481_v2 = vadd.f32 %v480_v63, %v479_v60 }
  0xa6   : > { %v698_v27 = vpop.permute.xlu1 %697 }
  0xa7   : > { %v493_v5 = vadd.f32 %v491_v62, %v481_v2  ;;  %v494_v7 = vmax.f32 %v492_v1, 0.0  ;;  %v704_v32 = vmul.f32 %v703_v28, %v698_v27  ;;  %v717_v35 = vpop.permute.xlu0 %716 }
  0xa8   : > { %v723_v38 = vmul.f32 %v722_v34, %v717_v35 }
  0xa9   : > { %v495_v9 = vmax.f32 %v493_v5, 0.0  ;;  %v508_v11 = vmul.f32 %v501_v8, %v494_v7 }
  0xab   : > { %v509_v10 = vmul.f32 %v505_v6, %v495_v9 }
  0xac   : > { %v707_v31 = vpop.permute.xlu1 %706 }
  0xad   : > { %607 = vmatprep.mubr.f32.mxu0 %v509_v10  ;;  %v713_v33 = vmul.f32 %v712_v29, %v707_v31 }
  0xae   : > { %608 = vmatmul.mubr.f32.vlgmr.msra.gmra.mxu0 %v508_v11 }
  0xaf   : > { %v714_v37 = vadd.f32 %v713_v33, %v704_v32 }
  0xb1   : > { %v724_v43 = vadd.f32 %v723_v38, %v714_v37  ;;  %v736_v47 = vpop.permute.xlu1 %735 }
  0xb2   : > { %v741_v48 = vrot.slane %v736_v47, %v1339_v55 }
 0x16e   : > { %v959_v20 = vpop.f32.mrf.mxu0 }
 0x170   : > { %v960_v22 = vpop.f32.mrf.mxu0 }
 0x171   : > { %v961_v23 = vadd.f32 %v960_v22, %v959_v20 }
 0x173   : > { %v610_v24 = vadd.f32 %v961_v23, %v542_v21 }
 0x175   : > { %v613_v25 = vmax.f32 %v610_v24, 0.0 }
 0x177   : > { %978 = vmatmul.mubr.msk.f32.vlgmr.msra.gmra.mxu1 %vm619_vm2, %v613_v25 }
 0x178   : > { %982 = vmatprep.mubr.msk.f32.mxu1 %vm1101_vm1, %v1100_v12 }
 0x237   : > { %v689_v39 = vpop.f32.mrf.mxu1 }
 0x238   : > { %v690_v40 = vadd.f32 %v689_v39, %v618_v36 }
 0x239   : > { %v979_v42 = vpop.f32.mrf.mxu1 }
 0x23a   : > { %v728_v44 = vrot.slane %v690_v40, %v1339_v55 }
 0x23c   : > { %v729_v41 = vadd.f32 %v728_v44, %v724_v43 }
 0x23e   : > { %v730_v45 = vmax.f32 %v729_v41, 0.0 }
 0x240   : > { %981 = vmatpush3.xpose.msk.msra.mxu1 %vm619_vm2, %v730_v45 }
 0x243   : > { %983 = vmatmul.mubr.msk.f32.vlgmr.msra.gmra.mxu1 %vm619_vm2, %v731_v46 }
 0x303   : > { %v814_v49 = vpop.f32.mrf.mxu1 }
 0x304   : > { %v815_v50 = vadd.f32 %v814_v49, %v741_v48 }
 0x305   : > { %v984_v51 = vpop.f32.mrf.mxu1 }
 0x306   : > { %819 = vst.msk [vmem:[%s435_s13] sm:$0x1] %vm818_vm3, %v815_v50 }
 0x307   : > { %1049 = shalt.err (!%p1046_p3)
}
 0x308   : > { %s1050_s30 = scalar_lea.hbm %s1393_s20, 16  ;;  %s1054_s17 = scalar_lea.hbm %s1439_s12, 32 }
 0x309   : > { %p1051_p4 = scmp.ne.s32.totalorder %s1393_s20, %s1050_s30  ;;  %p1055_p9 = scmp.lt.s32.totalorder %s1393_s20, %s1439_s12 }
 0x30a   : > { %p1056_p10 = scmp.lt.s32.totalorder %s1054_s17, %s1050_s30 }
 0x30b   : > { %p1052_p7 = pnand %p1051_p4, %p1214_p5 }
 0x30c   : > { %p1057_p11 = por %p1056_p10, %p1055_p9 }
 0x30d   : > { %p1053_p8 = pneg %p1052_p7 }
 0x30f   : > { %p1058_p12 = pnand %p1057_p11, %p1053_p8 }
 0x311   : > { %1061 = shalt.err (!%p1058_p12)
}
 0x312   : > { %985 = dma.vmem_to_hbm [thread:$0]  (%p1214_p5), %s834_s19, 16, %s1393_s20, %s821_s21  }
 0x313 PF: > { %p991_p13 = scmp.ge.s32.totalorder %s1096_s28, 2  ;;  %s845_s22 = sand.u32 1, %s1084_s25  }
 0x314   : > { %s846_s23 = scalar_lea.sflag [#allocation5], %s845_s22 }
 0x315   : > { %p988_p0 = pnand %p991_p13, %p1218_p6 }
 0x317   : > { %p989_p1 = pneg %p988_p0 }
 0x319   : > { %1079 = dma.done.wait (%p989_p1), %s846_s23, 16  }
 0x31a   : > { %1081 = vsyncadd (%p989_p1), %s846_s23, 4294967280  ;;  %p26_p2 = scmp.ge.s32.totalorder %s1201_s29, 4   ;;  %s1443_s25 = smov %s1088_s26 }
 0x31b   : > { %s1444_s26 = smov %s1092_s27  ;;  %s1445_s27 = smov %s1212_s14 }
 0x31c   : > { %s1446_s28 = smov %s1201_s29  ;;  %28 = sbr.rel (!%p26_p2) target bundleno = 6 (0x6), region = 109 }
 0x321   :  { %850 = vsyncpa [#allocation5], 1 }
 0x322   :  { %852 = vsyncpa [#allocation5 + $0x1], 1 }

</bundles_post_ra>
